<compile_context>
chip_gen: v6e
topology: v6e:2x2x1
jax: 0.10.0
libtpu: 0.0.40
codegen_flags: <defaults>
</compile_context>

<pallas_src>
import functools

import jax
import jax.numpy as jnp
from jax.experimental import pallas as pl
from jax.experimental.pallas import tpu as pltpu


# ---------------------------------------------------------------------------
# Fused kernel: LSTM recurrence (final cell state) + tag scorer + softmax
# ---------------------------------------------------------------------------
def _tag_sampler_kernel(x_ref, wx_ref, wh_ref, b_ref, tag_ref,
                        w1a_ref, w1b_ref, b1_ref, w2_ref, b2_ref,
                        out_ref, *, seq_len, batch):
    H = wh_ref.shape[0]

    # ---- hoisted input projection: all timesteps in ONE MXU matmul --------
    # x_ref: (S*B_pad, E) time-major rows; result (S*B_pad, 4H) stays in vregs
    # (only a handful of vregs at this size — no VMEM scratch round trip).
    xg = (jnp.dot(x_ref[...], wx_ref[...], preferred_element_type=jnp.float32)
          + b_ref[...])

    wh = wh_ref[...]                                   # (H, 4H), stays in vregs

    h = jnp.zeros((batch, H), jnp.float32)
    c = jnp.zeros((batch, H), jnp.float32)

    # ---- fully-unrolled recurrence (seq_len is static & small) ------------
    # TODO(synk): if the bundle dump shows Mosaic re-pushing the (H,4H) RHS
    # each step, switch to pltpu.matmul_push_rhs / matmul_acc_lhs residency.
    for t in range(seq_len):
        g_x = xg[t * batch:(t + 1) * batch]            # static, tile-aligned
        gates = g_x + jnp.dot(h, wh, preferred_element_type=jnp.float32)

        # 2 EUP passes over the full (B, 4H) gates vreg (no sliver passes)
        sig = jax.nn.sigmoid(gates)
        tnh = jnp.tanh(gates)

        i_g = sig[:, 0 * H:1 * H]                      # input gate
        f_g = sig[:, 1 * H:2 * H]                      # forget gate
        g_g = tnh[:, 2 * H:3 * H]                      # cell candidate
        o_g = sig[:, 3 * H:4 * H]                      # output gate

        c = f_g * c + i_g * g_g
        h = o_g * jnp.tanh(c)

    # ---- tag scorer: concat([tag, c]) -> linear1 -> relu -> linear2 -------
    # concat([tag, ctx]) @ W1^T  ==  tag @ W1a + ctx @ W1b
    a = jnp.dot(tag_ref[...], w1a_ref[...],
                preferred_element_type=jnp.float32)            # (T, H)
    cp = jnp.dot(c, w1b_ref[...],
                 preferred_element_type=jnp.float32)           # (B, H)

    hidden = a[None, :, :] + cp[:, None, :] + b1_ref[...][None, :, :]
    hidden = jnp.maximum(hidden, 0.0)                          # (B, T, H) ReLU

    # linear2: hidden @ w2^T + b2 (w2 given as (1, H) row vector)
    logits = jnp.sum(hidden * w2_ref[...][None, :, :], axis=-1)  # (B, T)
    logits = logits + b2_ref[...]                                # (1,1) bcast

    # stable softmax over tags; divide goes to the idle EUP slot
    m = jnp.max(logits, axis=-1, keepdims=True)
    e = jnp.exp(logits - m)
    denom = jnp.sum(e, axis=-1, keepdims=True)
    out_ref[...] = e * pl.reciprocal(denom, approx=True)


# ---------------------------------------------------------------------------
# Parameter preparation (done ONCE, outside the per-call path)
# ---------------------------------------------------------------------------
def prepare_params(params):
    H = params["w_hh"].shape[1]
    w1t = jnp.transpose(params["w1"])                 # (2H, H)
    return {
        "wx": jnp.transpose(params["w_ih"]),          # (E, 4H)
        "wh": jnp.transpose(params["w_hh"]),          # (H, 4H)
        "b": (params["b_ih"] + params["b_hh"]).reshape(1, 4 * H),
        "w1a": w1t[:H, :],                            # (H, H) tag half
        "w1b": w1t[H:, :],                            # (H, H) context half
        "b1": params["b1"].reshape(1, H),
        "w2": params["w2"].reshape(1, H),
        "b2": params["b2"].reshape(1, 1),
    }


# ---------------------------------------------------------------------------
# Full TagSampler forward — ONE pallas_call
# ---------------------------------------------------------------------------
@jax.jit
def tag_sampler_forward(emb, tag_embeddings, prepared):
    S, B, E = emb.shape
    H = prepared["wh"].shape[0]
    T = tag_embeddings.shape[0]

    # Pad batch to a full 8-row sublane tile: full occupancy on every
    # elementwise op and tile-aligned per-step slices in the recurrence.
    B_pad = max(8, ((B + 7) // 8) * 8)
    if B_pad != B:
        emb = jnp.pad(emb, ((0, 0), (0, B_pad - B), (0, 0)))

    x2d = emb.reshape(S * B_pad, E)    # free (row-major) reshape, time-major rows

    kernel = functools.partial(_tag_sampler_kernel, seq_len=S, batch=B_pad)
    vmem_spec = lambda: pl.BlockSpec(memory_space=pltpu.MemorySpace.VMEM)

    # Honest (tiny) cost so XLA schedules/overlaps around the custom call.
    flops = (2 * S * B_pad * E * 4 * H           # input projection
             + 2 * S * B_pad * H * 4 * H         # recurrence matmuls
             + 2 * T * H * H + 2 * B_pad * H * H  # scorer matmuls
             + 6 * B_pad * T * H)                # bias/relu/score reduce
    transcendentals = S * (2 * B_pad * 4 * H + B_pad * H) + 2 * B_pad * T
    bytes_accessed = 4 * (S * B_pad * E + E * 4 * H + H * 4 * H + 4 * H
                          + T * H + 2 * H * H + 2 * H + 1 + B_pad * T)

    probs = pl.pallas_call(
        kernel,
        out_shape=jax.ShapeDtypeStruct((B_pad, T), jnp.float32),
        in_specs=[vmem_spec() for _ in range(10)],
        out_specs=vmem_spec(),
        cost_estimate=pl.CostEstimate(
            flops=flops,
            transcendentals=transcendentals,
            bytes_accessed=bytes_accessed),
    )(x2d, prepared["wx"], prepared["wh"], prepared["b"], tag_embeddings,
      prepared["w1a"], prepared["w1b"], prepared["b1"],
      prepared["w2"], prepared["b2"])

    # Drop padded batch rows; PyTorch does .transpose(2, 1) on (B, T, 1)
    # -> (B, 1, T).
    return probs[:B, None, :]


# ---------------------------------------------------------------------------
# Pure-JAX reference for verification
# ---------------------------------------------------------------------------
def reference_forward(emb, tags, params):
    H = params["w_hh"].shape[1]
    B = emb.shape[1]

    def step(carry, x_t):
        h, c = carry
        gates = (x_t @ params["w_ih"].T + params["b_ih"]
                 + h @ params["w_hh"].T + params["b_hh"])
        i, f, g, o = jnp.split(gates, 4, axis=-1)
        c = jax.nn.sigmoid(f) * c + jax.nn.sigmoid(i) * jnp.tanh(g)
        h = jax.nn.sigmoid(o) * jnp.tanh(c)
        return (h, c), h

    (_, c), _ = jax.lax.scan(
        step, (jnp.zeros((B, H), jnp.float32), jnp.zeros((B, H), jnp.float32)),
        emb)
    T = tags.shape[0]
    state = jnp.concatenate(
        [jnp.broadcast_to(tags[None], (B, T, H)),
         jnp.broadcast_to(c[:, None], (B, T, H))], axis=-1)
    s = jnp.maximum(state @ params["w1"].T + params["b1"], 0.0)
    s = s @ params["w2"].T + params["b2"]          # (B, T, 1)
    s = jnp.transpose(s, (0, 2, 1))                # (B, 1, T)
    return jax.nn.softmax(s, axis=-1)


# ---------------------------------------------------------------------------
if __name__ == "__main__":
    S, B, E, H, T = 8, 2, 32, 32, 8   # seq, batch, emb dim, hidden, num tags

    key = jax.random.PRNGKey(0)
    ks = jax.random.split(key, 10)

    def u(k, shape, scale=0.1):
        return jax.random.uniform(k, shape, jnp.float32, -scale, scale)

    params = {
        # LSTM encoder parameters (single layer, unidirectional)
        "w_ih": u(ks[0], (4 * H, E)),
        "w_hh": u(ks[1], (4 * H, H)),
        "b_ih": u(ks[2], (4 * H,)),
        "b_hh": u(ks[3], (4 * H,)),
        # linear1: hidden_size*2 -> hidden_size
        "w1": u(ks[4], (H, 2 * H)),
        "b1": u(ks[5], (H,)),
        # linear2: hidden_size -> 1
        "w2": u(ks[6], (1, H)),
        "b2": u(ks[7], (1,)),
    }

    emb = jax.random.normal(ks[8], (S, B, E), jnp.float32)
    tag_embeddings = jax.random.normal(ks[9], (T, H), jnp.float32)

    prepared = jax.tree_util.tree_map(jnp.asarray, prepare_params(params))

    out = tag_sampler_forward(emb, tag_embeddings, prepared)
    out = jax.block_until_ready(out)

    ref = reference_forward(emb, tag_embeddings, params)
    assert out.shape == (B, 1, T), out.shape
    assert jnp.allclose(out, ref, atol=2e-3, rtol=2e-3), (
        f"max abs diff {jnp.max(jnp.abs(out - ref))}")

    print("KERNEL_OK")
</pallas_src>

<mosaic_0001>
module attributes {stable_mosaic.version = 11 : i64} {
  func.func @_tag_sampler_kernel(%arg0: memref<64x32xf32, #tpu.memory_space<vmem>>, %arg1: memref<32x128xf32, #tpu.memory_space<vmem>>, %arg2: memref<32x128xf32, #tpu.memory_space<vmem>>, %arg3: memref<1x128xf32, #tpu.memory_space<vmem>>, %arg4: memref<8x32xf32, #tpu.memory_space<vmem>>, %arg5: memref<32x32xf32, #tpu.memory_space<vmem>>, %arg6: memref<32x32xf32, #tpu.memory_space<vmem>>, %arg7: memref<1x32xf32, #tpu.memory_space<vmem>>, %arg8: memref<1x32xf32, #tpu.memory_space<vmem>>, %arg9: memref<1x1xf32, #tpu.memory_space<vmem>>, %arg10: memref<8x8xf32, #tpu.memory_space<vmem>>) attributes {dimension_semantics = [], scalar_prefetch = 0 : i64, scratch_operands = 0 : i64, tpu.core_type = #tpu.core_type<tc>} {
    %c0 = arith.constant 0 : index
    %c0_0 = arith.constant 0 : index
    %0 = vector.load %arg0[%c0, %c0_0] : memref<64x32xf32, #tpu.memory_space<vmem>>, vector<64x32xf32>
    %c0_1 = arith.constant 0 : index
    %c0_2 = arith.constant 0 : index
    %1 = vector.load %arg1[%c0_1, %c0_2] : memref<32x128xf32, #tpu.memory_space<vmem>>, vector<32x128xf32>
    %cst = arith.constant dense<0.000000e+00> : vector<64x128xf32>
    %2 = tpu.matmul %0, %1, %cst {dimension_numbers = #tpu.dot_dimension_numbers<[1], [0], [0], [1], [0, 0, 1, 1], [], []>} : vector<64x32xf32>, vector<32x128xf32>, vector<64x128xf32> -> vector<64x128xf32>
    %c0_3 = arith.constant 0 : index
    %c0_4 = arith.constant 0 : index
    %3 = vector.load %arg3[%c0_3, %c0_4] : memref<1x128xf32, #tpu.memory_space<vmem>>, vector<1x128xf32>
    %4 = vector.broadcast %3 : vector<1x128xf32> to vector<64x128xf32>
    %5 = arith.addf %2, %4 : vector<64x128xf32>
    %c0_5 = arith.constant 0 : index
    %c0_6 = arith.constant 0 : index
    %6 = vector.load %arg2[%c0_5, %c0_6] : memref<32x128xf32, #tpu.memory_space<vmem>>, vector<32x128xf32>
    %cst_7 = arith.constant 0.000000e+00 : f32
    %7 = vector.broadcast %cst_7 : f32 to vector<8x32xf32>
    %cst_8 = arith.constant 0.000000e+00 : f32
    %8 = vector.broadcast %cst_8 : f32 to vector<8x32xf32>
    %9 = vector.extract_strided_slice %5 {offsets = [0, 0], sizes = [8, 128], strides = [1, 1]} : vector<64x128xf32> to vector<8x128xf32>
    %cst_9 = arith.constant dense<0.000000e+00> : vector<8x128xf32>
    %10 = tpu.matmul %7, %6, %cst_9 {dimension_numbers = #tpu.dot_dimension_numbers<[1], [0], [0], [1], [0, 0, 1, 1], [], []>} : vector<8x32xf32>, vector<32x128xf32>, vector<8x128xf32> -> vector<8x128xf32>
    %11 = arith.addf %9, %10 : vector<8x128xf32>
    %12 = arith.negf %11 : vector<8x128xf32>
    %13 = math.exp %12 : vector<8x128xf32>
    %cst_10 = arith.constant 1.000000e+00 : f32
    %14 = vector.broadcast %cst_10 : f32 to vector<8x128xf32>
    %15 = arith.addf %14, %13 : vector<8x128xf32>
    %16 = arith.divf %14, %15 : vector<8x128xf32>
    %17 = math.tanh %11 : vector<8x128xf32>
    %18 = vector.extract_strided_slice %16 {offsets = [0, 0], sizes = [8, 32], strides = [1, 1]} : vector<8x128xf32> to vector<8x32xf32>
    %19 = vector.extract_strided_slice %16 {offsets = [0, 32], sizes = [8, 32], strides = [1, 1]} : vector<8x128xf32> to vector<8x32xf32>
    %20 = vector.extract_strided_slice %17 {offsets = [0, 64], sizes = [8, 32], strides = [1, 1]} : vector<8x128xf32> to vector<8x32xf32>
    %21 = vector.extract_strided_slice %16 {offsets = [0, 96], sizes = [8, 32], strides = [1, 1]} : vector<8x128xf32> to vector<8x32xf32>
    %22 = arith.mulf %19, %8 : vector<8x32xf32>
    %23 = arith.mulf %18, %20 : vector<8x32xf32>
    %24 = arith.addf %22, %23 : vector<8x32xf32>
    %25 = math.tanh %24 : vector<8x32xf32>
    %26 = arith.mulf %21, %25 : vector<8x32xf32>
    %27 = vector.extract_strided_slice %5 {offsets = [8, 0], sizes = [8, 128], strides = [1, 1]} : vector<64x128xf32> to vector<8x128xf32>
    %cst_11 = arith.constant dense<0.000000e+00> : vector<8x128xf32>
    %28 = tpu.matmul %26, %6, %cst_11 {dimension_numbers = #tpu.dot_dimension_numbers<[1], [0], [0], [1], [0, 0, 1, 1], [], []>} : vector<8x32xf32>, vector<32x128xf32>, vector<8x128xf32> -> vector<8x128xf32>
    %29 = arith.addf %27, %28 : vector<8x128xf32>
    %30 = arith.negf %29 : vector<8x128xf32>
    %31 = math.exp %30 : vector<8x128xf32>
    %cst_12 = arith.constant 1.000000e+00 : f32
    %32 = vector.broadcast %cst_12 : f32 to vector<8x128xf32>
    %33 = arith.addf %32, %31 : vector<8x128xf32>
    %34 = arith.divf %32, %33 : vector<8x128xf32>
    %35 = math.tanh %29 : vector<8x128xf32>
    %36 = vector.extract_strided_slice %34 {offsets = [0, 0], sizes = [8, 32], strides = [1, 1]} : vector<8x128xf32> to vector<8x32xf32>
    %37 = vector.extract_strided_slice %34 {offsets = [0, 32], sizes = [8, 32], strides = [1, 1]} : vector<8x128xf32> to vector<8x32xf32>
    %38 = vector.extract_strided_slice %35 {offsets = [0, 64], sizes = [8, 32], strides = [1, 1]} : vector<8x128xf32> to vector<8x32xf32>
    %39 = vector.extract_strided_slice %34 {offsets = [0, 96], sizes = [8, 32], strides = [1, 1]} : vector<8x128xf32> to vector<8x32xf32>
    %40 = arith.mulf %37, %24 : vector<8x32xf32>
    %41 = arith.mulf %36, %38 : vector<8x32xf32>
    %42 = arith.addf %40, %41 : vector<8x32xf32>
    %43 = math.tanh %42 : vector<8x32xf32>
    %44 = arith.mulf %39, %43 : vector<8x32xf32>
    %45 = vector.extract_strided_slice %5 {offsets = [16, 0], sizes = [8, 128], strides = [1, 1]} : vector<64x128xf32> to vector<8x128xf32>
    %cst_13 = arith.constant dense<0.000000e+00> : vector<8x128xf32>
    %46 = tpu.matmul %44, %6, %cst_13 {dimension_numbers = #tpu.dot_dimension_numbers<[1], [0], [0], [1], [0, 0, 1, 1], [], []>} : vector<8x32xf32>, vector<32x128xf32>, vector<8x128xf32> -> vector<8x128xf32>
    %47 = arith.addf %45, %46 : vector<8x128xf32>
    %48 = arith.negf %47 : vector<8x128xf32>
    %49 = math.exp %48 : vector<8x128xf32>
    %cst_14 = arith.constant 1.000000e+00 : f32
    %50 = vector.broadcast %cst_14 : f32 to vector<8x128xf32>
    %51 = arith.addf %50, %49 : vector<8x128xf32>
    %52 = arith.divf %50, %51 : vector<8x128xf32>
    %53 = math.tanh %47 : vector<8x128xf32>
    %54 = vector.extract_strided_slice %52 {offsets = [0, 0], sizes = [8, 32], strides = [1, 1]} : vector<8x128xf32> to vector<8x32xf32>
    %55 = vector.extract_strided_slice %52 {offsets = [0, 32], sizes = [8, 32], strides = [1, 1]} : vector<8x128xf32> to vector<8x32xf32>
    %56 = vector.extract_strided_slice %53 {offsets = [0, 64], sizes = [8, 32], strides = [1, 1]} : vector<8x128xf32> to vector<8x32xf32>
    %57 = vector.extract_strided_slice %52 {offsets = [0, 96], sizes = [8, 32], strides = [1, 1]} : vector<8x128xf32> to vector<8x32xf32>
    %58 = arith.mulf %55, %42 : vector<8x32xf32>
    %59 = arith.mulf %54, %56 : vector<8x32xf32>
    %60 = arith.addf %58, %59 : vector<8x32xf32>
    %61 = math.tanh %60 : vector<8x32xf32>
    %62 = arith.mulf %57, %61 : vector<8x32xf32>
    %63 = vector.extract_strided_slice %5 {offsets = [24, 0], sizes = [8, 128], strides = [1, 1]} : vector<64x128xf32> to vector<8x128xf32>
    %cst_15 = arith.constant dense<0.000000e+00> : vector<8x128xf32>
    %64 = tpu.matmul %62, %6, %cst_15 {dimension_numbers = #tpu.dot_dimension_numbers<[1], [0], [0], [1], [0, 0, 1, 1], [], []>} : vector<8x32xf32>, vector<32x128xf32>, vector<8x128xf32> -> vector<8x128xf32>
    %65 = arith.addf %63, %64 : vector<8x128xf32>
    %66 = arith.negf %65 : vector<8x128xf32>
    %67 = math.exp %66 : vector<8x128xf32>
    %cst_16 = arith.constant 1.000000e+00 : f32
    %68 = vector.broadcast %cst_16 : f32 to vector<8x128xf32>
    %69 = arith.addf %68, %67 : vector<8x128xf32>
    %70 = arith.divf %68, %69 : vector<8x128xf32>
    %71 = math.tanh %65 : vector<8x128xf32>
    %72 = vector.extract_strided_slice %70 {offsets = [0, 0], sizes = [8, 32], strides = [1, 1]} : vector<8x128xf32> to vector<8x32xf32>
    %73 = vector.extract_strided_slice %70 {offsets = [0, 32], sizes = [8, 32], strides = [1, 1]} : vector<8x128xf32> to vector<8x32xf32>
    %74 = vector.extract_strided_slice %71 {offsets = [0, 64], sizes = [8, 32], strides = [1, 1]} : vector<8x128xf32> to vector<8x32xf32>
    %75 = vector.extract_strided_slice %70 {offsets = [0, 96], sizes = [8, 32], strides = [1, 1]} : vector<8x128xf32> to vector<8x32xf32>
    %76 = arith.mulf %73, %60 : vector<8x32xf32>
    %77 = arith.mulf %72, %74 : vector<8x32xf32>
    %78 = arith.addf %76, %77 : vector<8x32xf32>
    %79 = math.tanh %78 : vector<8x32xf32>
    %80 = arith.mulf %75, %79 : vector<8x32xf32>
    %81 = vector.extract_strided_slice %5 {offsets = [32, 0], sizes = [8, 128], strides = [1, 1]} : vector<64x128xf32> to vector<8x128xf32>
    %cst_17 = arith.constant dense<0.000000e+00> : vector<8x128xf32>
    %82 = tpu.matmul %80, %6, %cst_17 {dimension_numbers = #tpu.dot_dimension_numbers<[1], [0], [0], [1], [0, 0, 1, 1], [], []>} : vector<8x32xf32>, vector<32x128xf32>, vector<8x128xf32> -> vector<8x128xf32>
    %83 = arith.addf %81, %82 : vector<8x128xf32>
    %84 = arith.negf %83 : vector<8x128xf32>
    %85 = math.exp %84 : vector<8x128xf32>
    %cst_18 = arith.constant 1.000000e+00 : f32
    %86 = vector.broadcast %cst_18 : f32 to vector<8x128xf32>
    %87 = arith.addf %86, %85 : vector<8x128xf32>
    %88 = arith.divf %86, %87 : vector<8x128xf32>
    %89 = math.tanh %83 : vector<8x128xf32>
    %90 = vector.extract_strided_slice %88 {offsets = [0, 0], sizes = [8, 32], strides = [1, 1]} : vector<8x128xf32> to vector<8x32xf32>
    %91 = vector.extract_strided_slice %88 {offsets = [0, 32], sizes = [8, 32], strides = [1, 1]} : vector<8x128xf32> to vector<8x32xf32>
    %92 = vector.extract_strided_slice %89 {offsets = [0, 64], sizes = [8, 32], strides = [1, 1]} : vector<8x128xf32> to vector<8x32xf32>
    %93 = vector.extract_strided_slice %88 {offsets = [0, 96], sizes = [8, 32], strides = [1, 1]} : vector<8x128xf32> to vector<8x32xf32>
    %94 = arith.mulf %91, %78 : vector<8x32xf32>
    %95 = arith.mulf %90, %92 : vector<8x32xf32>
    %96 = arith.addf %94, %95 : vector<8x32xf32>
    %97 = math.tanh %96 : vector<8x32xf32>
    %98 = arith.mulf %93, %97 : vector<8x32xf32>
    %99 = vector.extract_strided_slice %5 {offsets = [40, 0], sizes = [8, 128], strides = [1, 1]} : vector<64x128xf32> to vector<8x128xf32>
    %cst_19 = arith.constant dense<0.000000e+00> : vector<8x128xf32>
    %100 = tpu.matmul %98, %6, %cst_19 {dimension_numbers = #tpu.dot_dimension_numbers<[1], [0], [0], [1], [0, 0, 1, 1], [], []>} : vector<8x32xf32>, vector<32x128xf32>, vector<8x128xf32> -> vector<8x128xf32>
    %101 = arith.addf %99, %100 : vector<8x128xf32>
    %102 = arith.negf %101 : vector<8x128xf32>
    %103 = math.exp %102 : vector<8x128xf32>
    %cst_20 = arith.constant 1.000000e+00 : f32
    %104 = vector.broadcast %cst_20 : f32 to vector<8x128xf32>
    %105 = arith.addf %104, %103 : vector<8x128xf32>
    %106 = arith.divf %104, %105 : vector<8x128xf32>
    %107 = math.tanh %101 : vector<8x128xf32>
    %108 = vector.extract_strided_slice %106 {offsets = [0, 0], sizes = [8, 32], strides = [1, 1]} : vector<8x128xf32> to vector<8x32xf32>
    %109 = vector.extract_strided_slice %106 {offsets = [0, 32], sizes = [8, 32], strides = [1, 1]} : vector<8x128xf32> to vector<8x32xf32>
    %110 = vector.extract_strided_slice %107 {offsets = [0, 64], sizes = [8, 32], strides = [1, 1]} : vector<8x128xf32> to vector<8x32xf32>
    %111 = vector.extract_strided_slice %106 {offsets = [0, 96], sizes = [8, 32], strides = [1, 1]} : vector<8x128xf32> to vector<8x32xf32>
    %112 = arith.mulf %109, %96 : vector<8x32xf32>
    %113 = arith.mulf %108, %110 : vector<8x32xf32>
    %114 = arith.addf %112, %113 : vector<8x32xf32>
    %115 = math.tanh %114 : vector<8x32xf32>
    %116 = arith.mulf %111, %115 : vector<8x32xf32>
    %117 = vector.extract_strided_slice %5 {offsets = [48, 0], sizes = [8, 128], strides = [1, 1]} : vector<64x128xf32> to vector<8x128xf32>
    %cst_21 = arith.constant dense<0.000000e+00> : vector<8x128xf32>
    %118 = tpu.matmul %116, %6, %cst_21 {dimension_numbers = #tpu.dot_dimension_numbers<[1], [0], [0], [1], [0, 0, 1, 1], [], []>} : vector<8x32xf32>, vector<32x128xf32>, vector<8x128xf32> -> vector<8x128xf32>
    %119 = arith.addf %117, %118 : vector<8x128xf32>
    %120 = arith.negf %119 : vector<8x128xf32>
    %121 = math.exp %120 : vector<8x128xf32>
    %cst_22 = arith.constant 1.000000e+00 : f32
    %122 = vector.broadcast %cst_22 : f32 to vector<8x128xf32>
    %123 = arith.addf %122, %121 : vector<8x128xf32>
    %124 = arith.divf %122, %123 : vector<8x128xf32>
    %125 = math.tanh %119 : vector<8x128xf32>
    %126 = vector.extract_strided_slice %124 {offsets = [0, 0], sizes = [8, 32], strides = [1, 1]} : vector<8x128xf32> to vector<8x32xf32>
    %127 = vector.extract_strided_slice %124 {offsets = [0, 32], sizes = [8, 32], strides = [1, 1]} : vector<8x128xf32> to vector<8x32xf32>
    %128 = vector.extract_strided_slice %125 {offsets = [0, 64], sizes = [8, 32], strides = [1, 1]} : vector<8x128xf32> to vector<8x32xf32>
    %129 = vector.extract_strided_slice %124 {offsets = [0, 96], sizes = [8, 32], strides = [1, 1]} : vector<8x128xf32> to vector<8x32xf32>
    %130 = arith.mulf %127, %114 : vector<8x32xf32>
    %131 = arith.mulf %126, %128 : vector<8x32xf32>
    %132 = arith.addf %130, %131 : vector<8x32xf32>
    %133 = math.tanh %132 : vector<8x32xf32>
    %134 = arith.mulf %129, %133 : vector<8x32xf32>
    %135 = vector.extract_strided_slice %5 {offsets = [56, 0], sizes = [8, 128], strides = [1, 1]} : vector<64x128xf32> to vector<8x128xf32>
    %cst_23 = arith.constant dense<0.000000e+00> : vector<8x128xf32>
    %136 = tpu.matmul %134, %6, %cst_23 {dimension_numbers = #tpu.dot_dimension_numbers<[1], [0], [0], [1], [0, 0, 1, 1], [], []>} : vector<8x32xf32>, vector<32x128xf32>, vector<8x128xf32> -> vector<8x128xf32>
    %137 = arith.addf %135, %136 : vector<8x128xf32>
    %138 = arith.negf %137 : vector<8x128xf32>
    %139 = math.exp %138 : vector<8x128xf32>
    %cst_24 = arith.constant 1.000000e+00 : f32
    %140 = vector.broadcast %cst_24 : f32 to vector<8x128xf32>
    %141 = arith.addf %140, %139 : vector<8x128xf32>
    %142 = arith.divf %140, %141 : vector<8x128xf32>
    %143 = math.tanh %137 : vector<8x128xf32>
    %144 = vector.extract_strided_slice %142 {offsets = [0, 0], sizes = [8, 32], strides = [1, 1]} : vector<8x128xf32> to vector<8x32xf32>
    %145 = vector.extract_strided_slice %142 {offsets = [0, 32], sizes = [8, 32], strides = [1, 1]} : vector<8x128xf32> to vector<8x32xf32>
    %146 = vector.extract_strided_slice %143 {offsets = [0, 64], sizes = [8, 32], strides = [1, 1]} : vector<8x128xf32> to vector<8x32xf32>
    %147 = arith.mulf %145, %132 : vector<8x32xf32>
    %148 = arith.mulf %144, %146 : vector<8x32xf32>
    %149 = arith.addf %147, %148 : vector<8x32xf32>
    %c0_25 = arith.constant 0 : index
    %c0_26 = arith.constant 0 : index
    %150 = vector.load %arg4[%c0_25, %c0_26] : memref<8x32xf32, #tpu.memory_space<vmem>>, vector<8x32xf32>
    %c0_27 = arith.constant 0 : index
    %c0_28 = arith.constant 0 : index
    %151 = vector.load %arg5[%c0_27, %c0_28] : memref<32x32xf32, #tpu.memory_space<vmem>>, vector<32x32xf32>
    %cst_29 = arith.constant dense<0.000000e+00> : vector<8x32xf32>
    %152 = tpu.matmul %150, %151, %cst_29 {dimension_numbers = #tpu.dot_dimension_numbers<[1], [0], [0], [1], [0, 0, 1, 1], [], []>} : vector<8x32xf32>, vector<32x32xf32>, vector<8x32xf32> -> vector<8x32xf32>
    %c0_30 = arith.constant 0 : index
    %c0_31 = arith.constant 0 : index
    %153 = vector.load %arg6[%c0_30, %c0_31] : memref<32x32xf32, #tpu.memory_space<vmem>>, vector<32x32xf32>
    %cst_32 = arith.constant dense<0.000000e+00> : vector<8x32xf32>
    %154 = tpu.matmul %149, %153, %cst_32 {dimension_numbers = #tpu.dot_dimension_numbers<[1], [0], [0], [1], [0, 0, 1, 1], [], []>} : vector<8x32xf32>, vector<32x32xf32>, vector<8x32xf32> -> vector<8x32xf32>
    %155 = vector.shape_cast %152 : vector<8x32xf32> to vector<1x8x32xf32>
    %156 = vector.shape_cast %154 : vector<8x32xf32> to vector<8x1x32xf32>
    %157 = vector.broadcast %155 : vector<1x8x32xf32> to vector<8x8x32xf32>
    %158 = vector.broadcast %156 : vector<8x1x32xf32> to vector<8x8x32xf32>
    %159 = arith.addf %157, %158 : vector<8x8x32xf32>
    %c0_33 = arith.constant 0 : index
    %c0_34 = arith.constant 0 : index
    %160 = vector.load %arg7[%c0_33, %c0_34] : memref<1x32xf32, #tpu.memory_space<vmem>>, vector<1x32xf32>
    %161 = vector.shape_cast %160 : vector<1x32xf32> to vector<1x1x32xf32>
    %162 = vector.broadcast %161 : vector<1x1x32xf32> to vector<8x8x32xf32>
    %163 = arith.addf %159, %162 : vector<8x8x32xf32>
    %cst_35 = arith.constant 0.000000e+00 : f32
    %164 = vector.broadcast %cst_35 : f32 to vector<8x8x32xf32>
    %165 = arith.maximumf %163, %164 : vector<8x8x32xf32>
    %c0_36 = arith.constant 0 : index
    %c0_37 = arith.constant 0 : index
    %166 = vector.load %arg8[%c0_36, %c0_37] : memref<1x32xf32, #tpu.memory_space<vmem>>, vector<1x32xf32>
    %167 = vector.shape_cast %166 : vector<1x32xf32> to vector<1x1x32xf32>
    %168 = vector.broadcast %167 : vector<1x1x32xf32> to vector<8x8x32xf32>
    %169 = arith.mulf %165, %168 : vector<8x8x32xf32>
    %cst_38 = arith.constant dense<0.000000e+00> : vector<8x8xf32>
    %170 = vector.multi_reduction <add>, %169, %cst_38 [2] : vector<8x8x32xf32> to vector<8x8xf32>
    %c0_39 = arith.constant 0 : index
    %c0_40 = arith.constant 0 : index
    %171 = vector.load %arg9[%c0_39, %c0_40] : memref<1x1xf32, #tpu.memory_space<vmem>>, vector<1x1xf32>
    %172 = vector.broadcast %171 : vector<1x1xf32> to vector<8x8xf32>
    %173 = arith.addf %170, %172 : vector<8x8xf32>
    %cst_41 = arith.constant dense<0xFF800000> : vector<8xf32>
    %174 = vector.multi_reduction <maximumf>, %173, %cst_41 [1] : vector<8x8xf32> to vector<8xf32>
    %175 = vector.shape_cast %174 : vector<8xf32> to vector<8x1xf32>
    %176 = vector.broadcast %175 : vector<8x1xf32> to vector<8x8xf32>
    %177 = arith.subf %173, %176 : vector<8x8xf32>
    %178 = math.exp %177 : vector<8x8xf32>
    %cst_42 = arith.constant dense<0.000000e+00> : vector<8xf32>
    %179 = vector.multi_reduction <add>, %178, %cst_42 [1] : vector<8x8xf32> to vector<8xf32>
    %180 = vector.shape_cast %179 : vector<8xf32> to vector<8x1xf32>
    %181 = tpu.reciprocal %180 {approx = true} : vector<8x1xf32> -> vector<8x1xf32>
    %182 = vector.broadcast %181 : vector<8x1xf32> to vector<8x8xf32>
    %183 = arith.mulf %178, %182 : vector<8x8xf32>
    %c0_43 = arith.constant 0 : index
    %c0_44 = arith.constant 0 : index
    %184 = vector.load %arg10[%c0_43, %c0_44] : memref<8x8xf32, #tpu.memory_space<vmem>>, vector<8x8xf32>
    tpu.vector_store %arg10[%c0_43, %c0_44], %183 {strides = array<i32>} : memref<8x8xf32, #tpu.memory_space<vmem>>, vector<8x8xf32>,
    return
  }
}

</mosaic_0001>

<bundles_post_ra>
// kernel: tag_sampler_forward.1
= control target key start
LH: loop header
LB: loop body
LE: loop exit
PB: predicated region body
PF: predicated region fallthrough
CT: control target
= control target key end

     0   :  { %s2469_s0 = inlined_call_operand.vmem [shape: f32[64,32], index: 0, kind: input, shape index: {}]   ;;  %s2470_s1 = inlined_call_operand.vmem [shape: f32[32,128], index: 1, kind: input, shape index: {}]   ;;  %s2471_s2 = inlined_call_operand.vmem [shape: f32[32,128], index: 2, kind: input, shape index: {}]   ;;  %s2472_s3 = inlined_call_operand.vmem [shape: f32[1,128], index: 3, kind: input, shape index: {}]   ;;  %s2473_s4 = inlined_call_operand.vmem [shape: f32[8,32], index: 4, kind: input, shape index: {}]   ;;  %s2474_s5 = inlined_call_operand.hbm [shape: f32[32,32], index: 5, kind: input, shape index: {}]   ;;  %s2475_s6 = inlined_call_operand.hbm [shape: f32[32,32], index: 6, kind: input, shape index: {}]   ;;  %s2476_s7 = inlined_call_operand.vmem [shape: f32[1,32], index: 7, kind: input, shape index: {}]   ;;  %s2477_s8 = inlined_call_operand.vmem [shape: f32[1,32], index: 8, kind: input, shape index: {}]   ;;  %s2478_s9 = inlined_call_operand.<no memory space> [shape: f32[1,1], index: 9, kind: input, shape index: {}]   ;;  %s2479_s10 = inlined_call_operand.vmem [shape: f32[8,8], index: 10, kind: output, shape index: {}]  }
   0x1   :  { %v15_v0 = vstv %s2478_s9 }
   0x2   :  { %16 = vst [vmem:[#allocation2] sm:$0x1] %v15_v0 }
   0x3   :  { %17 = vsyncpa [#allocation4], 0 }
   0x4   :  { %18 = vsyncpa [#allocation6], 0  ;;  %s2033_s15 = smov [#allocation3]  }
   0x5   :  { %s34_s16 = sshll.u32 %s2033_s15, 4  ;;  %s35_s16 = int_to_ptr.vmem [resolvable:$true] %s34_s16 }
   0x6   :  { %s1997_s17 = scalar_lea.vmem %s35_s16, 512  ;;  %p2002_p1 = scmp.lt.s32.totalorder %s35_s16, %s35_s16 }
   0x7   :  { %p1998_p0 = scmp.ne.s32.totalorder %s35_s16, %s1997_s17  ;;  %p2003_p2 = scmp.lt.s32.totalorder %s1997_s17, %s1997_s17 }
   0x9   :  { %p2004_p3 = por %p2003_p2, %p2002_p1 }
   0xb   :  { %p2005_p4 = pnand %p2004_p3, %p1998_p0 }
   0xd   :  { %2008 = shalt.err (!%p2005_p4)
}
   0xe   :  { %s2034_s18 = smov 128   ;;  %s2035_s19 = smov 8  }
   0xf   :  { %40 = dma.hbm_to_vmem [thread:$0]  %s2474_s5, 512, %s35_s16, [#allocation4], %s2034_s18, %s2034_s18, %s2035_s19  }
  0x10   :  { %s2036_s9 = smov [#allocation5]  }
  0x11   :  { %s46_s22 = sshll.u32 %s2036_s9, 4  ;;  %s47_s22 = int_to_ptr.vmem [resolvable:$true] %s46_s22 }
  0x12   :  { %s2017_s23 = scalar_lea.vmem %s47_s22, 512  ;;  %p2022_p6 = scmp.lt.s32.totalorder %s47_s22, %s47_s22 }
  0x13   :  { %p2018_p5 = scmp.ne.s32.totalorder %s47_s22, %s2017_s23  ;;  %p2023_p7 = scmp.lt.s32.totalorder %s2017_s23, %s2017_s23 }
  0x15   :  { %p2024_p8 = por %p2023_p7, %p2022_p6 }
  0x17   :  { %p2025_p9 = pnand %p2024_p8, %p2018_p5 }
  0x19   :  { %2028 = shalt.err (!%p2025_p9)
}
  0x1a   :  { %52 = dma.hbm_to_vmem [thread:$0]  %s2475_s6, 512, %s47_s22, [#allocation6], %s2034_s18, %s2034_s18, %s2035_s19  }
  0x1b   :  { %2029 = dma.done.wait [#allocation4], 512  }
  0x1c   :  { %2030 = vsyncadd [#allocation4], 4294966784 }
  0x1d   :  { %2031 = dma.done.wait [#allocation6], 512  }
  0x1e   :  { %2032 = vsyncadd [#allocation6], 4294966784  ;;  %v2037_v1 = vmov 0.0   ;;  %vm2038_vm0 = vmmov 0   ;;  %v76_v2 = vld [vmem:[%s2470_s1 + $0x18] sm:$0xff]  ;;  %v75_v3 = vld [vmem:[%s2470_s1 + $0x10] sm:$0xff] }
  0x1f   :  { %1786 = vmatprep.subr.mxu1 %v2037_v1  ;;  %1794 = vmatprep.mubr.msk.f32.mxu1 %vm2038_vm0, %v2037_v1  ;;  %v2120_v4 = vld [vmem:[%s2471_s2 + $0x18] sm:$0xff]  ;;  %v2126_v5 = vld [vmem:[%s2471_s2 + $0x10] sm:$0xff]  ;;  %v74_v6 = vld [vmem:[%s2470_s1 + $0x8] sm:$0xff]  ;;  %vm84_vm1 = vcmask 261120   ;;  %s2039_s23 = smov 64   ;;  %s2041_s15 = smov 96  }
  0x20   :  { %1766 = vmatprep.subr.mxu0 %v76_v2  ;;  %1787 = vmatpush3.msra.mxu1 %v2120_v4  ;;  %v65_v7 = vld [vmem:[%s2469_s0] sm:$0xff]  ;;  %v2139_v8 = vld [vmem:[%s2471_s2 + $0x8] sm:$0xff]  ;;  %v67_v47 = vld [vmem:[%s2469_s0 + $0x10] sm:$0xff]  ;;  %vm1387_vm2 = vcmask 1041409   ;;  %vm1389_vm3 = vcmask 1042434   ;;  %vm1391_vm4 = vcmask 1043459  }
  0x21   :  { %1767 = vmatpush3.msra.mxu0 %v76_v2  ;;  %1788 = vmatprep.subr.mxu1 %v2037_v1  ;;  %v73_v9 = vld [vmem:[%s2470_s1] sm:$0xff]  ;;  %v66_v11 = vld [vmem:[%s2469_s0 + $0x8] sm:$0xff]  ;;  %v68_v48 = vld [vmem:[%s2469_s0 + $0x18] sm:$0xff]  ;;  %vm1393_vm5 = vcmask 1044484   ;;  %vm1395_vm6 = vcmask 1045509   ;;  %vm1397_vm7 = vcmask 1046534  }
  0x22   :  { %1768 = vmatprep.subr.mxu0 %v75_v3  ;;  %1789 = vmatpush3.msra.mxu1 %v2126_v5  ;;  %v2149_v10 = vld [vmem:[%s2471_s2] sm:$0xff]  ;;  %v70_v50 = vld [vmem:[%s2469_s0 + $0x28] sm:$0xff]  ;;  %v71_v51 = vld [vmem:[%s2469_s0 + $0x30] sm:$0xff]  ;;  %vm1399_vm8 = vcmask 1047559   ;;  %vm1402_vm9 = vcmask 64512  }
  0x23   :  { %1769 = vmatpush3.msra.mxu0 %v75_v3  ;;  %1790 = vmatprep.subr.mxu1 %v2037_v1  ;;  %v2182_v14 = vld [vmem:[%s2472_s3] ss:$0 sm:$0xff]  ;;  %s2040_s3 = smov 32   ;;  %v72_v52 = vld [vmem:[%s2469_s0 + $0x38] sm:$0xff] }
  0x24   :  { %1770 = vmatprep.subr.mxu0 %v74_v6  ;;  %1774 = vmatprep.mubr.msk.f32.mxu0 %vm84_vm1, %v65_v7  ;;  %v69_v49 = vld [vmem:[%s2469_s0 + $0x20] sm:$0xff] }
  0x25   :  { %1771 = vmatpush3.msra.mxu0 %v74_v6  ;;  %1791 = vmatpush3.msra.mxu1 %v2139_v8 }
  0x26   :  { %1772 = vmatprep.subr.mxu0 %v73_v9  ;;  %1792 = vmatprep.subr.mxu1 %v2037_v1 }
  0x27   :  { %1773 = vmatpush3.msra.mxu0 %v73_v9  ;;  %1793 = vmatpush3.msra.mxu1 %v2149_v10 }
  0x28   :  { %1775 = vmatmul.mubr.msk.f32.vlgmr.msra.gmra.mxu0 %vm84_vm1, %v66_v11  ;;  %1795 = vmatmul.mubr.f32.vlgmr.msra.gmra.mxu1 %v2037_v1 }
  0x29   :  { %1797 = vmatprep.subr.mxu1 %v2037_v1  ;;  %1805 = vmatprep.mubr.msk.f32.mxu1 %vm2038_vm0, %v2037_v1 }
  0x2a   :  { %1798 = vmatpush3.msra.mxu1 %v2120_v4  ;;  %1808 = vmatprep.subr.mxu0 %v2037_v1 }
  0x2b   :  { %1799 = vmatprep.subr.mxu1 %v2037_v1  ;;  %1809 = vmatpush3.msra.mxu0 %v2120_v4 }
  0x2c   :  { %1800 = vmatpush3.msra.mxu1 %v2126_v5  ;;  %1810 = vmatprep.subr.mxu0 %v2037_v1 }
  0x2d   :  { %1801 = vmatprep.subr.mxu1 %v2037_v1  ;;  %1811 = vmatpush3.msra.mxu0 %v2126_v5 }
  0x2e   :  { %1802 = vmatpush3.msra.mxu1 %v2139_v8  ;;  %1812 = vmatprep.subr.mxu0 %v2037_v1 }
  0x2f   :  { %1803 = vmatprep.subr.mxu1 %v2037_v1  ;;  %1813 = vmatpush3.msra.mxu0 %v2139_v8 }
  0x30   :  { %1804 = vmatpush3.msra.mxu1 %v2149_v10  ;;  %1814 = vmatprep.subr.mxu0 %v2037_v1 }
  0x31   :  { %1815 = vmatpush3.msra.mxu0 %v2149_v10  ;;  %1819 = vmatprep.subr.mxu1 %v2037_v1 }
  0x32   :  { %1830 = vmatprep.subr.mxu0 %v2037_v1  ;;  %1777 = vmatprep.mubr.msk.f32.mxu0 %vm84_vm1, %v67_v47 }
  0x33   :  { %1778 = vmatmul.mubr.msk.f32.gmra.mxu0 %vm84_vm1, %v68_v48 }
  0x34   :  { %1780 = vmatprep.mubr.msk.f32.mxu0 %vm84_vm1, %v69_v49 }
  0x37   :  { %1781 = vmatmul.mubr.msk.f32.gmra.mxu0 %vm84_vm1, %v70_v50 }
  0x38   :  { %1783 = vmatprep.mubr.msk.f32.mxu0 %vm84_vm1, %v71_v51 }
  0x3b   :  { %1784 = vmatmul.mubr.msk.f32.gmra.mxu0 %vm84_vm1, %v72_v52 }
  0x3c   :  { %1816 = vmatprep.mubr.msk.f32.mxu0 %vm2038_vm0, %v2037_v1 }
  0xe8   :  { %v1776_v12 = vpop.f32.mrf.mxu0  ;;  %v287_v13 = vpop.f32.mrf.mxu1 }
  0xe9   :  { %v181_v33 = vadd.f32 %v1776_v12, %v2182_v14 }
  0xea   :  { %v175_v15 = vpop.f32.mrf.mxu0  ;;  %v1796_v16 = vpop.f32.mrf.mxu1 }
  0xeb   :  { %v176_v17 = vadd.f32 %v2182_v14, %v175_v15 }
  0xed   :  { %v291_v18 = vadd.f32 %v287_v13, %v176_v17 }
  0xef   :  { %1909 = vtanh.f32 %v291_v18  ;;  %v1684_v20 = vmul.f32 -1.442695, %v291_v18 }
  0xf1   :  { %1911 = vpow2.f32 %v1684_v20 }
  0xf3   :  { %v1779_v57 = vpop.f32.mrf.mxu0 }
  0xf5   :  { %v185_v58 = vpop.f32.mrf.mxu0 }
  0xf6   :  { %v186_v63 = vadd.f32 %v2182_v14, %v185_v58 }
  0xf7   :  { %v2242_v59 = vpop.f32.mrf.mxu0 }
  0xf9   :  { %v2244_v60 = vpop.f32.mrf.mxu0 }
  0xfb   :  { %v2246_v61 = vpop.f32.mrf.mxu0 }
  0xfc   :  { %v1910_v19 = vpop.eup %1909 }
  0xfd   :  { %301 = vrot.lane.b32.xlu0 %v1910_v19, %s2039_s23  ;;  %v2248_v62 = vpop.f32.mrf.mxu0 }
  0xfe   :  { %v1912_v21 = vpop.eup %1911 }
  0xff   :  { %v295_v22 = vadd.f32 1.0, %v1912_v21 }
 0x101   :  { %1913 = vrcp.f32 %v295_v22 }
 0x10e   :  { %v1914_v23 = vpop.eup %1913 }
 0x10f   :  { %v299_v26 = vmul.f32 0.0, %v1914_v23 }
 0x16f   :  { %v302_v24 = vpop.permute.xlu0 %301 }
 0x170   :  { %v304_v25 = vmul.f32 %v1914_v23, %v302_v24 }
 0x172   :  { %306 = vrot.lane.b32.xlu0 %v304_v25, %s2040_s3 }
 0x1e4   :  { %v307_v27 = vpop.permute.xlu0 %306 }
 0x1e5   :  { %v309_v28 = vadd.f32 %v307_v27, %v299_v26 }
 0x1e7   :  { %1915 = vtanh.f32 %v309_v28 }
 0x1f4   :  { %v1916_v29 = vpop.eup %1915 }
 0x1f5   :  { %312 = vrot.lane.b32.xlu1 %v1916_v29, %s2039_s23 }
 0x267   :  { %v313_v30 = vpop.permute.xlu1 %312 }
 0x268   :  { %v315_v31 = vmul.f32 %v1914_v23, %v313_v30  ;;  %v191_v23 = vadd.f32 %v1779_v57, %v2182_v14 }
 0x26a   :  { %317 = vrot.lane.b32.xlu1 %v315_v31, %s2040_s3 }
 0x2dc   :  { %v318_v32 = vpop.permute.xlu1 %317 }
 0x2dd   :  { %1806 = vmatmul.mubr.msk.f32.vlgmr.msra.gmra.mxu1 %vm84_vm1, %v318_v32 }
 0x2de   :  { %1820 = vmatpush3.msra.mxu1 %v2120_v4  ;;  %1827 = vmatprep.mubr.msk.f32.mxu1 %vm2038_vm0, %v2037_v1 }
 0x2df   :  { %1821 = vmatprep.subr.mxu1 %v2037_v1 }
 0x2e0   :  { %1822 = vmatpush3.msra.mxu1 %v2126_v5 }
 0x2e1   :  { %1823 = vmatprep.subr.mxu1 %v2037_v1 }
 0x2e2   :  { %1824 = vmatpush3.msra.mxu1 %v2139_v8 }
 0x2e3   :  { %1825 = vmatprep.subr.mxu1 %v2037_v1 }
 0x2e4   :  { %1826 = vmatpush3.msra.mxu1 %v2149_v10 }
 0x2e5   :  { %1841 = vmatprep.subr.mxu1 %v2037_v1 }
 0x39d   :  { %v387_v34 = vpop.f32.mrf.mxu1 }
 0x39e   :  { %v391_v35 = vadd.f32 %v387_v34, %v181_v33 }
 0x39f   :  { %v1807_v36 = vpop.f32.mrf.mxu1 }
 0x3a0   :  { %1917 = vtanh.f32 %v391_v35  ;;  %v1686_v38 = vmul.f32 -1.442695, %v391_v35 }
 0x3a2   :  { %1919 = vpow2.f32 %v1686_v38 }
 0x3ad   :  { %v1918_v37 = vpop.eup %1917 }
 0x3ae   :  { %401 = vrot.lane.b32.xlu0 %v1918_v37, %s2039_s23 }
 0x3af   :  { %v1920_v39 = vpop.eup %1919 }
 0x3b0   :  { %v395_v40 = vadd.f32 1.0, %v1920_v39 }
 0x3b2   :  { %1921 = vrcp.f32 %v395_v40 }
 0x3bf   :  { %v1922_v41 = vpop.eup %1921 }
 0x3c0   :  { %v399_v44 = vmul.f32 %v1922_v41, %v309_v28 }
 0x420   :  { %v402_v42 = vpop.permute.xlu0 %401 }
 0x421   :  { %v404_v43 = vmul.f32 %v1922_v41, %v402_v42 }
 0x423   :  { %406 = vrot.lane.b32.xlu1 %v404_v43, %s2040_s3 }
 0x495   :  { %v407_v45 = vpop.permute.xlu1 %406 }
 0x496   :  { %v409_v46 = vadd.f32 %v407_v45, %v399_v44 }
 0x498   :  { %1923 = vtanh.f32 %v409_v46 }
 0x4a5   :  { %v1924_v53 = vpop.eup %1923 }
 0x4a6   :  { %412 = vrot.lane.b32.xlu0 %v1924_v53, %s2039_s23 }
 0x518   :  { %v413_v54 = vpop.permute.xlu0 %412 }
 0x519   :  { %v415_v55 = vmul.f32 %v1922_v41, %v413_v54  ;;  %v196_v41 = vadd.f32 %v2182_v14, %v2244_v60 }
 0x51b   :  { %417 = vrot.lane.b32.xlu1 %v415_v55, %s2040_s3 }
 0x58d   :  { %v418_v56 = vpop.permute.xlu1 %417 }
 0x58e   :  { %1817 = vmatmul.mubr.msk.f32.vlgmr.msra.gmra.mxu0 %vm84_vm1, %v418_v56 }
 0x58f   :  { %1831 = vmatpush3.msra.mxu0 %v2120_v4  ;;  %1838 = vmatprep.mubr.msk.f32.mxu0 %vm2038_vm0, %v2037_v1 }
 0x590   :  { %1832 = vmatprep.subr.mxu0 %v2037_v1 }
 0x591   :  { %1833 = vmatpush3.msra.mxu0 %v2126_v5 }
 0x592   :  { %1834 = vmatprep.subr.mxu0 %v2037_v1 }
 0x593   :  { %1835 = vmatpush3.msra.mxu0 %v2139_v8 }
 0x594   :  { %1836 = vmatprep.subr.mxu0 %v2037_v1 }
 0x595   :  { %1837 = vmatpush3.msra.mxu0 %v2149_v10 }
 0x596   :  { %1852 = vmatprep.subr.mxu0 %v2037_v1 }
 0x64e   :  { %v487_v0 = vpop.f32.mrf.mxu0 }
 0x64f   :  { %v491_v2 = vadd.f32 %v487_v0, %v186_v63 }
 0x650   :  { %v1818_v3 = vpop.f32.mrf.mxu0 }
 0x651   :  { %1925 = vtanh.f32 %v491_v2  ;;  %v1688_v7 = vmul.f32 -1.442695, %v491_v2 }
 0x653   :  { %1927 = vpow2.f32 %v1688_v7 }
 0x65e   :  { %v1926_v6 = vpop.eup %1925 }
 0x65f   :  { %501 = vrot.lane.b32.xlu0 %v1926_v6, %s2039_s23 }
 0x660   :  { %v1928_v9 = vpop.eup %1927 }
 0x661   :  { %v495_v11 = vadd.f32 1.0, %v1928_v9 }
 0x663   :  { %1929 = vrcp.f32 %v495_v11 }
 0x670   :  { %v1930_v12 = vpop.eup %1929 }
 0x671   :  { %v499_v16 = vmul.f32 %v1930_v12, %v409_v46 }
 0x6d1   :  { %v502_v13 = vpop.permute.xlu0 %501 }
 0x6d2   :  { %v504_v15 = vmul.f32 %v1930_v12, %v502_v13 }
 0x6d4   :  { %506 = vrot.lane.b32.xlu1 %v504_v15, %s2040_s3 }
 0x746   :  { %v507_v17 = vpop.permute.xlu1 %506 }
 0x747   :  { %v509_v18 = vadd.f32 %v507_v17, %v499_v16  ;;  %v206_v17 = vadd.f32 %v2182_v14, %v2248_v62 }
 0x749   :  { %1931 = vtanh.f32 %v509_v18 }
 0x756   :  { %v1932_v19 = vpop.eup %1931 }
 0x757   :  { %512 = vrot.lane.b32.xlu0 %v1932_v19, %s2039_s23 }
 0x7c9   :  { %v513_v20 = vpop.permute.xlu0 %512 }
 0x7ca   :  { %v515_v21 = vmul.f32 %v1930_v12, %v513_v20 }
 0x7cc   :  { %517 = vrot.lane.b32.xlu1 %v515_v21, %s2040_s3 }
 0x83e   :  { %v518_v22 = vpop.permute.xlu1 %517 }
 0x83f   :  { %1828 = vmatmul.mubr.msk.f32.vlgmr.msra.gmra.mxu1 %vm84_vm1, %v518_v22 }
 0x840   :  { %1842 = vmatpush3.msra.mxu1 %v2120_v4  ;;  %1849 = vmatprep.mubr.msk.f32.mxu1 %vm2038_vm0, %v2037_v1 }
 0x841   :  { %1843 = vmatprep.subr.mxu1 %v2037_v1 }
 0x842   :  { %1844 = vmatpush3.msra.mxu1 %v2126_v5 }
 0x843   :  { %1845 = vmatprep.subr.mxu1 %v2037_v1 }
 0x844   :  { %1846 = vmatpush3.msra.mxu1 %v2139_v8 }
 0x845   :  { %1847 = vmatprep.subr.mxu1 %v2037_v1 }
 0x846   :  { %1848 = vmatpush3.msra.mxu1 %v2149_v10 }
 0x847   :  { %1863 = vmatprep.subr.mxu1 %v2037_v1 }
 0x8ff   :  { %v587_v24 = vpop.f32.mrf.mxu1 }
 0x900   :  { %v591_v25 = vadd.f32 %v587_v24, %v191_v23 }
 0x901   :  { %v1829_v26 = vpop.f32.mrf.mxu1 }
 0x902   :  { %1933 = vtanh.f32 %v591_v25  ;;  %v1690_v28 = vmul.f32 -1.442695, %v591_v25 }
 0x904   :  { %1935 = vpow2.f32 %v1690_v28 }
 0x90f   :  { %v1934_v27 = vpop.eup %1933 }
 0x910   :  { %601 = vrot.lane.b32.xlu0 %v1934_v27, %s2039_s23 }
 0x911   :  { %v1936_v29 = vpop.eup %1935 }
 0x912   :  { %v595_v30 = vadd.f32 1.0, %v1936_v29 }
 0x914   :  { %1937 = vrcp.f32 %v595_v30 }
 0x921   :  { %v1938_v31 = vpop.eup %1937 }
 0x922   :  { %v599_v34 = vmul.f32 %v1938_v31, %v509_v18 }
 0x982   :  { %v602_v32 = vpop.permute.xlu0 %601 }
 0x983   :  { %v604_v33 = vmul.f32 %v1938_v31, %v602_v32 }
 0x985   :  { %606 = vrot.lane.b32.xlu1 %v604_v33, %s2040_s3 }
 0x9f7   :  { %v607_v35 = vpop.permute.xlu1 %606 }
 0x9f8   :  { %v609_v36 = vadd.f32 %v607_v35, %v599_v34  ;;  %v211_v34 = vadd.f32 %v2246_v61, %v2182_v14 }
 0x9fa   :  { %1939 = vtanh.f32 %v609_v36 }
 0xa07   :  { %v1940_v37 = vpop.eup %1939 }
 0xa08   :  { %612 = vrot.lane.b32.xlu0 %v1940_v37, %s2039_s23 }
 0xa7a   :  { %v613_v38 = vpop.permute.xlu0 %612 }
 0xa7b   :  { %v615_v39 = vmul.f32 %v1938_v31, %v613_v38 }
 0xa7d   :  { %617 = vrot.lane.b32.xlu1 %v615_v39, %s2040_s3 }
 0xaef   :  { %v618_v40 = vpop.permute.xlu1 %617 }
 0xaf0   :  { %1839 = vmatmul.mubr.msk.f32.vlgmr.msra.gmra.mxu0 %vm84_vm1, %v618_v40 }
 0xaf1   :  { %1853 = vmatpush3.msra.mxu0 %v2120_v4  ;;  %1860 = vmatprep.mubr.msk.f32.mxu0 %vm2038_vm0, %v2037_v1 }
 0xaf2   :  { %1854 = vmatprep.subr.mxu0 %v2037_v1 }
 0xaf3   :  { %1855 = vmatpush3.msra.mxu0 %v2126_v5 }
 0xaf4   :  { %1856 = vmatprep.subr.mxu0 %v2037_v1 }
 0xaf5   :  { %1857 = vmatpush3.msra.mxu0 %v2139_v8 }
 0xaf6   :  { %1858 = vmatprep.subr.mxu0 %v2037_v1 }
 0xaf7   :  { %1859 = vmatpush3.msra.mxu0 %v2149_v10 }
 0xaf8   :  { %1874 = vmatprep.subr.mxu0 %v2037_v1 }
 0xbb0   :  { %v687_v42 = vpop.f32.mrf.mxu0 }
 0xbb1   :  { %v691_v43 = vadd.f32 %v687_v42, %v196_v41  ;;  %v1091_v42 = vld [vmem:[#allocation5 + $0x18] sm:$0xff] }
 0xbb2   :  { %v1840_v44 = vpop.f32.mrf.mxu0 }
 0xbb3   :  { %1941 = vtanh.f32 %v691_v43  ;;  %v1692_v46 = vmul.f32 -1.442695, %v691_v43  ;;  %v1090_v43 = vld [vmem:[#allocation5 + $0x10] sm:$0xff]  ;;  %v1014_v44 = vld [vmem:[#allocation3 + $0x18] sm:$0xff] }
 0xbb5   :  { %1943 = vpow2.f32 %v1692_v46 }
 0xbc0   :  { %v1942_v45 = vpop.eup %1941 }
 0xbc1   :  { %701 = vrot.lane.b32.xlu0 %v1942_v45, %s2039_s23  ;;  %v1089_v45 = vld [vmem:[#allocation5 + $0x8] sm:$0xff] }
 0xbc2   :  { %v1944_v47 = vpop.eup %1943 }
 0xbc3   :  { %v695_v48 = vadd.f32 1.0, %v1944_v47 }
 0xbc5   :  { %1945 = vrcp.f32 %v695_v48  ;;  %v1013_v48 = vld [vmem:[#allocation3 + $0x10] sm:$0xff] }
 0xbd2   :  { %v1946_v49 = vpop.eup %1945 }
 0xbd3   :  { %v699_v52 = vmul.f32 %v1946_v49, %v609_v36 }
 0xc33   :  { %v702_v50 = vpop.permute.xlu0 %701 }
 0xc34   :  { %v704_v51 = vmul.f32 %v1946_v49, %v702_v50  ;;  %v1011_v50 = vld [vmem:[#allocation3] sm:$0xff] }
 0xc36   :  { %706 = vrot.lane.b32.xlu1 %v704_v51, %s2040_s3  ;;  %v1010_v51 = vld [vmem:[%s2473_s4] sm:$0xff] }
 0xca8   :  { %v707_v53 = vpop.permute.xlu1 %706 }
 0xca9   :  { %v709_v54 = vadd.f32 %v707_v53, %v699_v52 }
 0xcab   :  { %1947 = vtanh.f32 %v709_v54 }
 0xcb8   :  { %v1948_v55 = vpop.eup %1947 }
 0xcb9   :  { %712 = vrot.lane.b32.xlu0 %v1948_v55, %s2039_s23 }
 0xd2b   :  { %v713_v56 = vpop.permute.xlu0 %712 }
 0xd2c   :  { %v715_v57 = vmul.f32 %v1946_v49, %v713_v56  ;;  %v1012_v49 = vld [vmem:[#allocation3 + $0x8] sm:$0xff] }
 0xd2e   :  { %717 = vrot.lane.b32.xlu1 %v715_v57, %s2040_s3 }
 0xda0   :  { %v718_v58 = vpop.permute.xlu1 %717 }
 0xda1   :  { %1850 = vmatmul.mubr.msk.f32.vlgmr.msra.gmra.mxu1 %vm84_vm1, %v718_v58  ;;  %v2042_v58 = vmov 0  }
 0xda2   :  { %1864 = vmatpush3.msra.mxu1 %v2120_v4  ;;  %1871 = vmatprep.mubr.msk.f32.mxu1 %vm2038_vm0, %v2037_v1  ;;  %v201_v4 = vadd.f32 %v2242_v59, %v2182_v14  ;;  %v1088_v14 = vld [vmem:[#allocation5] sm:$0xff] }
 0xda3   :  { %1865 = vmatprep.subr.mxu1 %v2037_v1  ;;  %1907 = vset.pattern.permute.xlu0 %v2042_v58 }
 0xda4   :  { %1866 = vmatpush3.msra.mxu1 %v2126_v5  ;;  %1908 = vset.pattern.permute.xlu1 %v2042_v58 }
 0xda5   :  { %1867 = vmatprep.subr.mxu1 %v2037_v1 }
 0xda6   :  { %1868 = vmatpush3.msra.mxu1 %v2139_v8 }
 0xda7   :  { %1869 = vmatprep.subr.mxu1 %v2037_v1 }
 0xda8   :  { %1870 = vmatpush3.msra.mxu1 %v2149_v10 }
 0xda9   :  { %1885 = vmatprep.subr.mxu1 %v2037_v1 }
 0xe61   :  { %v787_v60 = vpop.f32.mrf.mxu1 }
 0xe62   :  { %v791_v63 = vadd.f32 %v787_v60, %v201_v4  ;;  %v2043_v4 = vmov 1966171168  }
 0xe63   :  { %v1851_v0 = vpop.f32.mrf.mxu1  ;;  %v1170_v60 = vunpack.c.l.s4 %v2043_v4 }
 0xe64   :  { %1949 = vtanh.f32 %v791_v63  ;;  %v1694_v5 = vmul.f32 -1.442695, %v791_v63  ;;  %v1172_v63 = vlaneseq }
 0xe66   :  { %1951 = vpow2.f32 %v1694_v5  ;;  %v2333_v0 = vshrl.u32 %v1172_v63, 7 }
 0xe71   :  { %v1950_v2 = vpop.eup %1949 }
 0xe72   :  { %801 = vrot.lane.b32.xlu0 %v1950_v2, %s2039_s23 }
 0xe73   :  { %v1952_v3 = vpop.eup %1951 }
 0xe74   :  { %v795_v8 = vadd.f32 1.0, %v1952_v3 }
 0xe76   :  { %1953 = vrcp.f32 %v795_v8 }
 0xe83   :  { %v1954_v6 = vpop.eup %1953 }
 0xe84   :  { %v799_v9 = vmul.f32 %v1954_v6, %v709_v54 }
 0xee4   :  { %v802_v7 = vpop.permute.xlu0 %801 }
 0xee5   :  { %v804_v10 = vmul.f32 %v1954_v6, %v802_v7 }
 0xee7   :  { %806 = vrot.lane.b32.xlu1 %v804_v10, %s2040_s3 }
 0xf59   :  { %v807_v11 = vpop.permute.xlu1 %806 }
 0xf5a   :  { %v809_v59 = vadd.f32 %v807_v11, %v799_v9 }
 0xf5c   :  { %1955 = vtanh.f32 %v809_v59 }
 0xf69   :  { %v1956_v12 = vpop.eup %1955 }
 0xf6a   :  { %812 = vrot.lane.b32.xlu0 %v1956_v12, %s2039_s23 }
 0xfdc   :  { %v813_v13 = vpop.permute.xlu0 %812 }
 0xfdd   :  { %v815_v15 = vmul.f32 %v1954_v6, %v813_v13  ;;  %v2337_v6 = vsub.s32 0, %v2333_v0 }
 0xfdf   :  { %817 = vrot.lane.b32.xlu1 %v815_v15, %s2040_s3 }
0x1051   :  { %v818_v16 = vpop.permute.xlu1 %817 }
0x1052   :  { %1861 = vmatmul.mubr.msk.f32.vlgmr.msra.gmra.mxu0 %vm84_vm1, %v818_v16 }
0x1053   :  { %1882 = vmatprep.mubr.msk.f32.mxu0 %vm2038_vm0, %v2037_v1  ;;  %1875 = vmatpush3.msra.mxu0 %v1014_v44 }
0x1054   :  { %1876 = vmatprep.subr.mxu0 %v2037_v1 }
0x1055   :  { %1877 = vmatpush3.msra.mxu0 %v1013_v48 }
0x1056   :  { %1878 = vmatprep.subr.mxu0 %v2037_v1 }
0x1057   :  { %1879 = vmatpush3.msra.mxu0 %v1012_v49 }
0x1058   :  { %1880 = vmatprep.subr.mxu0 %v2037_v1 }
0x1059   :  { %1881 = vmatpush3.msra.mxu0 %v1011_v50 }
0x105a   :  { %1883 = vmatmul.mubr.msk.f32.vlgmr.msra.gmra.mxu0 %vm84_vm1, %v1010_v51 }
0x1112   :  { %v887_v18 = vpop.f32.mrf.mxu0 }
0x1113   :  { %v891_v19 = vadd.f32 %v887_v18, %v206_v17 }
0x1114   :  { %v1862_v20 = vpop.f32.mrf.mxu0 }
0x1115   :  { %1957 = vtanh.f32 %v891_v19  ;;  %v1696_v22 = vmul.f32 -1.442695, %v891_v19 }
0x1117   :  { %1959 = vpow2.f32 %v1696_v22 }
0x111a   :  { %v1084_v56 = vpop.f32.mrf.mxu0 }
0x111c   :  { %v1884_v57 = vpop.f32.mrf.mxu0 }
0x1122   :  { %v1958_v21 = vpop.eup %1957 }
0x1123   :  { %901 = vrot.lane.b32.xlu0 %v1958_v21, %s2039_s23  ;;  %v1701_v21 = vld [vmem:[%s2476_s7] ss:$0 sm:$0xff] }
0x1124   :  { %v1960_v23 = vpop.eup %1959 }
0x1125   :  { %v895_v24 = vadd.f32 1.0, %v1960_v23 }
0x1127   :  { %1961 = vrcp.f32 %v895_v24 }
0x1134   :  { %v1962_v25 = vpop.eup %1961 }
0x1135   :  { %v899_v28 = vmul.f32 %v1962_v25, %v809_v59 }
0x1195   :  { %v902_v26 = vpop.permute.xlu0 %901 }
0x1196   :  { %v904_v27 = vmul.f32 %v1962_v25, %v902_v26 }
0x1198   :  { %906 = vrot.lane.b32.xlu1 %v904_v27, %s2040_s3 }
0x120a   :  { %v907_v29 = vpop.permute.xlu1 %906 }
0x120b   :  { %v909_v62 = vadd.f32 %v907_v29, %v899_v28 }
0x120d   :  { %1963 = vtanh.f32 %v909_v62 }
0x121a   :  { %v1964_v30 = vpop.eup %1963 }
0x121b   :  { %912 = vrot.lane.b32.xlu0 %v1964_v30, %s2039_s23 }
0x128d   :  { %v913_v31 = vpop.permute.xlu0 %912 }
0x128e   :  { %v915_v32 = vmul.f32 %v1962_v25, %v913_v31 }
0x1290   :  { %917 = vrot.lane.b32.xlu1 %v915_v32, %s2040_s3  ;;  %v1702_v32 = vld [vmem:[%s2477_s8] ss:$0 sm:$0xff] }
0x1302   :  { %v918_v33 = vpop.permute.xlu1 %917 }
0x1303   :  { %1872 = vmatmul.mubr.msk.f32.vlgmr.msra.gmra.mxu1 %vm84_vm1, %v918_v33 }
0x1304   :  { %1893 = vmatprep.mubr.msk.f32.mxu1 %vm2038_vm0, %v2037_v1  ;;  %1886 = vmatpush3.msra.mxu1 %v1091_v42 }
0x1305   :  { %1887 = vmatprep.subr.mxu1 %v2037_v1 }
0x1306   :  { %1888 = vmatpush3.msra.mxu1 %v1090_v43 }
0x1307   :  { %1889 = vmatprep.subr.mxu1 %v2037_v1 }
0x1308   :  { %1890 = vmatpush3.msra.mxu1 %v1089_v45 }
0x1309   :  { %1891 = vmatprep.subr.mxu1 %v2037_v1  ;;  %v1171_v1 = vunpack.c.0.s8 %v1170_v60 }
0x130a   :  { %1892 = vmatpush3.msra.mxu1 %v1088_v14 }
0x130b   :  { %v1174_v2 = vsub.s32 %v1171_v1, %v2333_v0 }
0x13c3   :  { %v987_v35 = vpop.f32.mrf.mxu1 }
0x13c4   :  { %v991_v36 = vadd.f32 %v987_v35, %v211_v34 }
0x13c5   :  { %v1873_v37 = vpop.f32.mrf.mxu1 }
0x13c6   :  { %1965 = vtanh.f32 %v991_v36  ;;  %v1698_v39 = vmul.f32 -1.442695, %v991_v36 }
0x13c8   :  { %1967 = vpow2.f32 %v1698_v39 }
0x13d3   :  { %v1966_v38 = vpop.eup %1965 }
0x13d4   :  { %1001 = vrot.lane.b32.xlu0 %v1966_v38, %s2039_s23 }
0x13d5   :  { %v1968_v40 = vpop.eup %1967 }
0x13d6   :  { %v995_v41 = vadd.f32 1.0, %v1968_v40 }
0x13d8   :  { %1969 = vrcp.f32 %v995_v41 }
0x13e5   :  { %v1970_v61 = vpop.eup %1969 }
0x13e6   :  { %v999_v52 = vmul.f32 %v1970_v61, %v909_v62 }
0x1446   :  { %v1002_v46 = vpop.permute.xlu0 %1001 }
0x1447   :  { %v1004_v47 = vmul.f32 %v1970_v61, %v1002_v46 }
0x1449   :  { %1006 = vrot.lane.b32.xlu1 %v1004_v47, %s2040_s3 }
0x14bb   :  { %v1007_v53 = vpop.permute.xlu1 %1006 }
0x14bc   :  { %v1009_v54 = vadd.f32 %v1007_v53, %v999_v52 }
0x14be   :  { %1093 = vrot.lane.b32.xlu0 %v1009_v54, %s2041_s15 }
0x1530   :  { %v1094_v55 = vpop.permute.xlu0 %1093 }
0x1531   :  { %1894 = vmatmul.mubr.msk.f32.vlgmr.msra.gmra.mxu1 %vm84_vm1, %v1094_v55 }
0x15f1   :  { %v1163_v5 = vpop.f32.mrf.mxu1 }
0x15f2   :  { %v1168_v3 = vcombine.high %v1163_v5, %v1163_v5  ;;  %v1175_v8 = vrot.slane %v1163_v5, %v1174_v2 }
0x15f3   :  { %v1895_v7 = vpop.f32.mrf.mxu1 }
0x15f4   :  { %v1182_v10 = vrot.slane %v1168_v3, %v1174_v2  ;;  %v1183_v9 = vcombine.high %v1175_v8, %v1175_v8  ;;  %v1191_v11 = vrot.slane %v1175_v8, %v1174_v2 }
0x15f6   :  { %v1184_v59 = vcombine.high %v1182_v10, %v1182_v10  ;;  %v1198_v12 = vrot.slane %v1182_v10, %v1174_v2  ;;  %v1205_v13 = vrot.slane %v1183_v9, %v1174_v2  ;;  %v1213_v15 = vcombine.high %v1191_v11, %v1191_v11  ;;  %v1703_v10 = vld [vmem:[#allocation2] ss:$0 sm:$0xff] }
0x15f7   :  { %v1220_v16 = vrot.slane %v1191_v11, %v2337_v6 }
0x15f8   :  { %v1212_v17 = vrot.slane %v1184_v59, %v1174_v2  ;;  %v1214_v18 = vcombine.high %v1198_v12, %v1198_v12  ;;  %v1215_v19 = vcombine.high %v1205_v13, %v1205_v13  ;;  %v1224_v20 = vrot.slane %v1205_v13, %v2337_v6 }
0x15f9   :  { %v1228_v22 = vrot.slane %v1213_v15, %v2337_v6  ;;  %v1236_v23 = vrot.slane %v1198_v12, %v2337_v6  ;;  %v1257_v24 = vadd.f32 %v1220_v16, %v1084_v56  ;;  %v1354_v15 = vand.u32 127, %v1172_v63 }
0x15fa   :  { %v1216_v25 = vcombine.high %v1212_v17, %v1212_v17  ;;  %v1258_v26 = vadd.f32 %v1224_v20, %v1084_v56  ;;  %v1232_v27 = vrot.slane %v1215_v19, %v2337_v6  ;;  %v1240_v28 = vrot.slane %v1212_v17, %v2337_v6 }
0x15fb   :  { %v1272_v29 = vadd.f32 %v1701_v21, %v1257_v24  ;;  %v1259_v62 = vadd.f32 %v1228_v22, %v1084_v56  ;;  %v1261_v30 = vadd.f32 %v1236_v23, %v1084_v56  ;;  %v1244_v31 = vrot.slane %v1214_v18, %v2337_v6 }
0x15fc   :  { %v1273_v33 = vadd.f32 %v1701_v21, %v1258_v26  ;;  %v1260_v34 = vadd.f32 %v1232_v27, %v1084_v56  ;;  %v1262_v35 = vadd.f32 %v1240_v28, %v1084_v56  ;;  %v1248_v36 = vrot.slane %v1216_v25, %v2337_v6 }
0x15fd   :  { %v1280_v37 = vmax.f32 %v1272_v29, 0.0  ;;  %v1274_v38 = vadd.f32 %v1701_v21, %v1259_v62  ;;  %v1276_v39 = vadd.f32 %v1701_v21, %v1261_v30  ;;  %v1263_v40 = vadd.f32 %v1244_v31, %v1084_v56 }
0x15fe   :  { %v1281_v41 = vmax.f32 %v1273_v33, 0.0  ;;  %v1275_v42 = vadd.f32 %v1701_v21, %v1260_v34  ;;  %v1277_v43 = vadd.f32 %v1701_v21, %v1262_v35  ;;  %v1264_v44 = vadd.f32 %v1248_v36, %v1084_v56 }
0x15ff   :  { %v1295_v45 = vmul.f32 %v1702_v32, %v1280_v37  ;;  %v1282_v14 = vmax.f32 %v1274_v38, 0.0  ;;  %v1284_v49 = vmax.f32 %v1276_v39, 0.0  ;;  %v1278_v54 = vadd.f32 %v1701_v21, %v1263_v40 }
0x1600   :  { %v1296_v61 = vmul.f32 %v1702_v32, %v1281_v41  ;;  %v1283_v46 = vmax.f32 %v1275_v42, 0.0  ;;  %v1285_v48 = vmax.f32 %v1277_v43, 0.0  ;;  %v1279_v50 = vadd.f32 %v1701_v21, %v1264_v44 }
0x1601   :  { %v1303_v47 = vsel %vm84_vm1, %v1295_v45, 0.0  ;;  %v1297_v53 = vmul.f32 %v1702_v32, %v1282_v14  ;;  %v1299_v4 = vmul.f32 %v1702_v32, %v1284_v49  ;;  %v1286_v60 = vmax.f32 %v1278_v54, 0.0 }
0x1602   :  { %1304 = vadd.xlane.f32.xlu1 %v1303_v47  ;;  %v1306_v51 = vsel %vm84_vm1, %v1296_v61, 0.0  ;;  %v1298_v52 = vmul.f32 %v1702_v32, %v1283_v46  ;;  %v1300_v57 = vmul.f32 %v1702_v32, %v1285_v48  ;;  %v1287_v56 = vmax.f32 %v1279_v50, 0.0 }
0x1603   :  { %1307 = vadd.xlane.f32.xlu0 %v1306_v51  ;;  %v1309_v58 = vsel %vm84_vm1, %v1297_v53, 0.0  ;;  %v1315_v5 = vsel %vm84_vm1, %v1299_v4, 0.0  ;;  %v1301_v3 = vmul.f32 %v1702_v32, %v1286_v60  ;;  %v2363_v18 = vsub.s32 %v1354_v15, %v2333_v0 }
0x1604   :  { %v1312_v55 = vsel %vm84_vm1, %v1298_v52, 0.0  ;;  %v1318_v1 = vsel %vm84_vm1, %v1300_v57, 0.0  ;;  %v1302_v2 = vmul.f32 %v1702_v32, %v1287_v56  ;;  %v1413_v43 = vsub.s32 1, %v2333_v0 }
0x1605   :  { %v1321_v7 = vsel %vm84_vm1, %v1301_v3, 0.0  ;;  %v1437_v44 = vsub.s32 7, %v2333_v0  ;;  %v1417_v45 = vsub.s32 2, %v2333_v0  ;;  %v1421_v48 = vsub.s32 3, %v2333_v0 }
0x1606   :  { %1313 = vadd.xlane.f32.xlu1 %v1312_v55  ;;  %v1324_v8 = vsel %vm84_vm1, %v1302_v2, 0.0  ;;  %v1425_v53 = vsub.s32 4, %v2333_v0 }
0x1607   :  { %1310 = vadd.xlane.f32.xlu0 %v1309_v58  ;;  %v1429_v58 = vsub.s32 5, %v2333_v0 }
0x160a   :  { %1319 = vadd.xlane.f32.xlu1 %v1318_v1 }
0x160b   :  { %1316 = vadd.xlane.f32.xlu0 %v1315_v5  ;;  %v1433_v5 = vsub.s32 6, %v2333_v0 }
0x160e   :  { %1325 = vadd.xlane.f32.xlu1 %v1324_v8 }
0x160f   :  { %1322 = vadd.xlane.f32.xlu0 %v1321_v7 }
0x1625   :  { %1334 = vperm.xlu0 %1907, %v1703_v10  }
0x168b   :  { %v1305_v59 = vpop.xlane.xlu1 %1304 }
0x168c   :  { %v1308_v9 = vpop.xlane.xlu0 %1307 }
0x168f   :  { %v1314_v13 = vpop.xlane.xlu1 %1313 }
0x1690   :  { %v1311_v11 = vpop.xlane.xlu0 %1310 }
0x1693   :  { %v1320_v17 = vpop.xlane.xlu1 %1319 }
0x1694   :  { %v1317_v12 = vpop.xlane.xlu0 %1316 }
0x1697   :  { %v1326_v28 = vpop.xlane.xlu1 %1325 }
0x1698   :  { %v1323_v16 = vpop.xlane.xlu0 %1322 }
0x16a0   :  { %v1335_v19 = vpop.permute.xlu0 %1334 }
0x16a1   :  { %v1337_v20 = vadd.f32 %v1335_v19, %v1305_v59  ;;  %v1338_v21 = vadd.f32 %v1335_v19, %v1308_v9  ;;  %v1339_v22 = vadd.f32 %v1335_v19, %v1311_v11  ;;  %v1340_v23 = vadd.f32 %v1335_v19, %v1314_v13 }
0x16a2   :  { %v2365_v24 = vadd.f32 %v1335_v19, %v1317_v12  ;;  %v2367_v25 = vadd.f32 %v1335_v19, %v1320_v17  ;;  %v2372_v29 = vadd.f32 %v1335_v19, %v1323_v16  ;;  %v1344_v62 = vadd.f32 %v1335_v19, %v1326_v28 }
0x16a3   :  { %v1358_v26 = vrot.slane %v1337_v20, %v2363_v18  ;;  %v1362_v63 = vrot.slane %v1338_v21, %v2363_v18  ;;  %v1366_v27 = vrot.slane %v1339_v22, %v2363_v18  ;;  %v1370_v30 = vrot.slane %v1340_v23, %v2363_v18 }
0x16a4   :  { %v1374_v32 = vrot.slane %v2365_v24, %v2363_v18  ;;  %v1378_v34 = vrot.slane %v2367_v25, %v2363_v18  ;;  %v1382_v36 = vrot.slane %v2372_v29, %v2363_v18  ;;  %v1386_v38 = vrot.slane %v1344_v62, %v2363_v18 }
0x16a5   :  { %v1388_v31 = vsel %vm1387_vm2, %v1362_v63, %v1358_v26 }
0x16a6   :  { %v1390_v33 = vsel %vm1389_vm3, %v1366_v27, %v1388_v31 }
0x16a7   :  { %v1392_v35 = vsel %vm1391_vm4, %v1370_v30, %v1390_v33 }
0x16a8   :  { %v1394_v37 = vsel %vm1393_vm5, %v1374_v32, %v1392_v35 }
0x16a9   :  { %v1396_v39 = vsel %vm1395_vm6, %v1378_v34, %v1394_v37 }
0x16aa   :  { %v1398_v40 = vsel %vm1397_vm7, %v1382_v36, %v1396_v39 }
0x16ab   :  { %v1400_v41 = vsel %vm1399_vm8, %v1386_v38, %v1398_v40 }
0x16ac   :  { %v1403_v42 = vsel %vm1402_vm9, %v1400_v41, -inf }
0x16ad   :  { %1404 = vmax.xlane.f32.xlu1 %v1403_v42 }
0x1736   :  { %v1405_v14 = vpop.xlane.xlu1 %1404 }
0x1737   :  { %v1410_v61 = vrot.slane %v1405_v14, %v2337_v6  ;;  %v1414_v46 = vrot.slane %v1405_v14, %v1413_v43  ;;  %v1438_v47 = vrot.slane %v1405_v14, %v1437_v44  ;;  %v1418_v49 = vrot.slane %v1405_v14, %v1417_v45 }
0x1738   :  { %v1422_v55 = vrot.slane %v1405_v14, %v1421_v48  ;;  %v1426_v60 = vrot.slane %v1405_v14, %v1425_v53  ;;  %v1430_v3 = vrot.slane %v1405_v14, %v1429_v58  ;;  %v1434_v10 = vrot.slane %v1405_v14, %v1433_v5 }
0x1739   :  { %v1447_v50 = vsub.f32 %v1337_v20, %v1410_v61  ;;  %v1448_v51 = vsub.f32 %v1338_v21, %v1414_v46  ;;  %v1454_v54 = vsub.f32 %v1344_v62, %v1438_v47  ;;  %v1449_v57 = vsub.f32 %v1339_v22, %v1418_v49 }
0x173a   :  { %v1450_v1 = vsub.f32 %v1340_v23, %v1422_v55  ;;  %v1451_v8 = vsub.f32 %v2365_v24, %v1426_v60  ;;  %v1452_v9 = vsub.f32 %v2367_v25, %v1430_v3  ;;  %v1453_v12 = vsub.f32 %v2372_v29, %v1434_v10 }
0x173b   :  { %v1455_v52 = vmul.f32 1.442695, %v1447_v50  ;;  %v1457_v56 = vmul.f32 1.442695, %v1448_v51  ;;  %v1469_v4 = vmul.f32 1.442695, %v1454_v54 }
0x173c   :  { %v1459_v2 = vmul.f32 1.442695, %v1449_v57  ;;  %v1461_v7 = vmul.f32 1.442695, %v1450_v1  ;;  %v1463_v11 = vmul.f32 1.442695, %v1451_v8 }
0x173d   :  { %1971 = vpow2.f32 %v1455_v52  ;;  %v1465_v13 = vmul.f32 1.442695, %v1452_v9  ;;  %v1467_v17 = vmul.f32 1.442695, %v1453_v12 }
0x173e   :  { %1973 = vpow2.f32 %v1457_v56 }
0x173f   :  { %1975 = vpow2.f32 %v1469_v4 }
0x1740   :  { %1977 = vpow2.f32 %v1459_v2 }
0x1741   :  { %1979 = vpow2.f32 %v1461_v7 }
0x1742   :  { %1981 = vpow2.f32 %v1463_v11 }
0x1743   :  { %1983 = vpow2.f32 %v1465_v13 }
0x1744   :  { %1985 = vpow2.f32 %v1467_v17 }
0x174a   :  { %v1972_v59 = vpop.eup %1971 }
0x174b   :  { %1480 = vperm.xlu1 %1908, %v1972_v59   ;;  %v1974_v15 = vpop.eup %1973 }
0x174c   :  { %v2415_v16 = vpop.eup %1975 }
0x174d   :  { %v1978_v19 = vpop.eup %1977  ;;  %1501 = vperm.xlu0 %1907, %v2415_v16  }
0x174e   :  { %v1980_v20 = vpop.eup %1979 }
0x174f   :  { %1483 = vperm.xlu1 %1908, %v1974_v15   ;;  %v1982_v21 = vpop.eup %1981 }
0x1750   :  { %v1984_v22 = vpop.eup %1983 }
0x1751   :  { %v1986_v23 = vpop.eup %1985 }
0x1753   :  { %1486 = vperm.xlu1 %1908, %v1978_v19  }
0x1757   :  { %1489 = vperm.xlu1 %1908, %v1980_v20  }
0x175b   :  { %1492 = vperm.xlu1 %1908, %v1982_v21  }
0x175f   :  { %1495 = vperm.xlu1 %1908, %v1984_v22  }
0x1763   :  { %1498 = vperm.xlu1 %1908, %v1986_v23  }
0x17c6   :  { %v1481_v24 = vpop.permute.xlu1 %1480 }
0x17c7   :  { %v1506_v62 = vrot.slane %v1481_v24, %v2363_v18 }
0x17c8   :  { %v1502_v35 = vpop.permute.xlu0 %1501 }
0x17c9   :  { %v1534_v41 = vrot.slane %v1502_v35, %v2363_v18 }
0x17ca   :  { %v1484_v25 = vpop.permute.xlu1 %1483 }
0x17cb   :  { %v1510_v28 = vrot.slane %v1484_v25, %v2363_v18 }
0x17cd   :  { %v1535_v33 = vsel %vm1387_vm2, %v1510_v28, %v1506_v62 }
0x17ce   :  { %v1487_v26 = vpop.permute.xlu1 %1486 }
0x17cf   :  { %v1514_v29 = vrot.slane %v1487_v26, %v2363_v18 }
0x17d1   :  { %v1536_v36 = vsel %vm1389_vm3, %v1514_v29, %v1535_v33 }
0x17d2   :  { %v1490_v63 = vpop.permute.xlu1 %1489 }
0x17d3   :  { %v1518_v30 = vrot.slane %v1490_v63, %v2363_v18 }
0x17d5   :  { %v1537_v37 = vsel %vm1391_vm4, %v1518_v30, %v1536_v36 }
0x17d6   :  { %v1493_v27 = vpop.permute.xlu1 %1492 }
0x17d7   :  { %v1522_v32 = vrot.slane %v1493_v27, %v2363_v18 }
0x17d9   :  { %v1538_v39 = vsel %vm1393_vm5, %v1522_v32, %v1537_v37 }
0x17da   :  { %v1496_v31 = vpop.permute.xlu1 %1495 }
0x17db   :  { %v1526_v34 = vrot.slane %v1496_v31, %v2363_v18 }
0x17dd   :  { %v1539_v42 = vsel %vm1395_vm6, %v1526_v34, %v1538_v39 }
0x17de   :  { %v1499_v38 = vpop.permute.xlu1 %1498 }
0x17df   :  { %v1530_v40 = vrot.slane %v1499_v38, %v2363_v18 }
0x17e1   :  { %v1540_v14 = vsel %vm1397_vm7, %v1530_v40, %v1539_v42 }
0x17e2   :  { %v1541_v61 = vsel %vm1399_vm8, %v1534_v41, %v1540_v14 }
0x17e3   :  { %v1543_v46 = vsel %vm1402_vm9, %v1541_v61, 0.0 }
0x17e4   :  { %1544 = vadd.xlane.f32.xlu1 %v1543_v46 }
0x186d   :  { %v1545_v47 = vpop.xlane.xlu1 %1544 }
0x186e   :  { %1987 = vrcp.f32 %v1545_v47 }
0x187b   :  { %v1988_v49 = vpop.eup %1987 }
0x187c   :  { %v1551_v50 = vrot.slane %v1988_v49, %v2337_v6  ;;  %v1555_v52 = vrot.slane %v1988_v49, %v1413_v43  ;;  %v1559_v55 = vrot.slane %v1988_v49, %v1417_v45  ;;  %v1563_v56 = vrot.slane %v1988_v49, %v1421_v48 }
0x187d   :  { %v1567_v60 = vrot.slane %v1988_v49, %v1425_v53  ;;  %v1571_v43 = vrot.slane %v1988_v49, %v1429_v58  ;;  %v1575_v45 = vrot.slane %v1988_v49, %v1433_v5  ;;  %v1579_v48 = vrot.slane %v1988_v49, %v1437_v44 }
0x187e   :  { %v1588_v51 = vmul.f32 %v1972_v59, %v1551_v50  ;;  %v1589_v54 = vmul.f32 %v1974_v15, %v1555_v52  ;;  %v1590_v57 = vmul.f32 %v1978_v19, %v1559_v55  ;;  %v1591_v4 = vmul.f32 %v1980_v20, %v1563_v56 }
0x187f   :  { %v1592_v6 = vmul.f32 %v1982_v21, %v1567_v60  ;;  %v1593_v1 = vmul.f32 %v1984_v22, %v1571_v43  ;;  %v1594_v2 = vmul.f32 %v1986_v23, %v1575_v45  ;;  %v1595_v3 = vmul.f32 %v2415_v16, %v1579_v48 }
0x1880   :  { %1605 = vperm.xlu0 %1907, %v1588_v51  }
0x1884   :  { %1608 = vperm.xlu0 %1907, %v1589_v54  }
0x1888   :  { %1611 = vperm.xlu0 %1907, %v1590_v57  }
0x188c   :  { %1614 = vperm.xlu0 %1907, %v1591_v4  }
0x1890   :  { %1617 = vperm.xlu0 %1907, %v1592_v6  }
0x1894   :  { %1620 = vperm.xlu0 %1907, %v1593_v1  }
0x1898   :  { %1623 = vperm.xlu0 %1907, %v1594_v2  }
0x189c   :  { %1626 = vperm.xlu0 %1907, %v1595_v3  }
0x18fb   :  { %v1606_v53 = vpop.permute.xlu0 %1605 }
0x18fc   :  { %v1631_v5 = vrot.slane %v1606_v53, %v2363_v18 }
0x18ff   :  { %v1609_v8 = vpop.permute.xlu0 %1608 }
0x1900   :  { %v1635_v11 = vrot.slane %v1609_v8, %v2363_v18 }
0x1902   :  { %v1660_v13 = vsel %vm1387_vm2, %v1635_v11, %v1631_v5 }
0x1903   :  { %v1612_v7 = vpop.permute.xlu0 %1611 }
0x1904   :  { %v1639_v59 = vrot.slane %v1612_v7, %v2363_v18 }
0x1906   :  { %v1661_v16 = vsel %vm1389_vm3, %v1639_v59, %v1660_v13 }
0x1907   :  { %v1615_v10 = vpop.permute.xlu0 %1614 }
0x1908   :  { %v1643_v12 = vrot.slane %v1615_v10, %v2363_v18 }
0x190a   :  { %v1662_v19 = vsel %vm1391_vm4, %v1643_v12, %v1661_v16 }
0x190b   :  { %v1618_v9 = vpop.permute.xlu0 %1617 }
0x190c   :  { %v1647_v0 = vrot.slane %v1618_v9, %v2363_v18 }
0x190e   :  { %v1663_v20 = vsel %vm1393_vm5, %v1647_v0, %v1662_v19 }
0x190f   :  { %v1621_v58 = vpop.permute.xlu0 %1620 }
0x1910   :  { %v1651_v15 = vrot.slane %v1621_v58, %v2363_v18 }
0x1912   :  { %v1664_v22 = vsel %vm1395_vm6, %v1651_v15, %v1663_v20 }
0x1913   :  { %v1624_v44 = vpop.permute.xlu0 %1623 }
0x1914   :  { %v1655_v17 = vrot.slane %v1624_v44, %v2363_v18 }
0x1916   :  { %v1665_v24 = vsel %vm1397_vm7, %v1655_v17, %v1664_v22 }
0x1917   :  { %v1627_v21 = vpop.permute.xlu0 %1626 }
0x1918   :  { %v1659_v23 = vrot.slane %v1627_v21, %v2363_v18 }
0x191a   :  { %v1666_v25 = vsel %vm1399_vm8, %v1659_v23, %v1665_v24 }
0x191b   :  { %1668 = vst.msk [vmem:[%s2479_s10] sm:$0xff] %vm1402_vm9, %v1666_v25 }
0x191c   :  { %1673 = vsyncpa [#allocation4], 1 }
0x191d   :  { %1674 = vsyncpa [#allocation6], 1 }

</bundles_post_ra>
